<compile_context>
chip_gen: v6e
topology: v6e:2x2x1
jax: 0.10.0
libtpu: 0.0.40
codegen_flags: <defaults>
</compile_context>

<pallas_src>
import functools
import math

import jax
import jax.numpy as jnp
from jax.experimental import pallas as pl
from jax.experimental.pallas import tpu as pltpu


def _round_up(x, m):
    return ((x + m - 1) // m) * m


def gated_fusion_kernel(x_ref, y_ref,
                        wx_ref, bx_ref,
                        wy_ref, by_ref,
                        wo_ref, bo_ref,
                        out_ref, acc_ref, *, x_gate: bool):
    k = pl.program_id(1)

    @pl.when(k == 0)
    def _():
        acc_ref[...] = jnp.zeros_like(acc_ref)

    x = x_ref[...]
    y = y_ref[...]

    # fc_x / fc_y for this dim-chunk (MXU matmuls, f32 accumulation).
    out_x = jnp.dot(x, wx_ref[...], preferred_element_type=jnp.float32) + bx_ref[...]
    out_y = jnp.dot(y, wy_ref[...], preferred_element_type=jnp.float32) + by_ref[...]

    # Static gate direction -> no runtime selects, fewer live vregs.
    if x_gate:
        gate_src, other = out_x, out_y
    else:
        gate_src, other = out_y, out_x

    # sigmoid(z) = 1 / (1 + exp(-z)); exp + reciprocal use the EUP slot.
    gate = pl.reciprocal(1.0 + jnp.exp(-gate_src), approx=False)
    fused = gate * other

    # fc_out contribution from this dim-chunk, accumulated in f32.
    acc_ref[...] += jnp.dot(fused.astype(wo_ref.dtype), wo_ref[...],
                            preferred_element_type=jnp.float32)

    @pl.when(k == pl.num_programs(1) - 1)
    def _():
        out_ref[...] = (acc_ref[...] + bo_ref[...]).astype(out_ref.dtype)


def gated_fusion(x, y, params, x_gate=True, *, tile_m=None, tile_d=None):
    wx, bx, wy, by, wo, bo = params
    B, K = x.shape
    D = wx.shape[1]
    N = wo.shape[1]

    # ---- lane-dense padding (hidden dim and output dim -> multiples of 128)
    D_pad = _round_up(D, 128)
    N_pad = _round_up(N, 128)

    if tile_d is None:
        tile_d = min(D_pad, 512)              # dim chunk (K-accumulation tile)
    D_pad = _round_up(D_pad, tile_d)

    if tile_m is None:
        tile_m = min(_round_up(B, 8), 256)    # batch tile
    B_pad = _round_up(B, tile_m)

    pad2 = lambda a, r, c: jnp.pad(a, ((0, r - a.shape[0]), (0, c - a.shape[1])))
    x_p = pad2(x, B_pad, K)
    y_p = pad2(y, B_pad, K)
    wx_p = pad2(wx, K, D_pad)
    bx_p = pad2(bx, 1, D_pad)
    wy_p = pad2(wy, K, D_pad)
    by_p = pad2(by, 1, D_pad)
    wo_p = pad2(wo, D_pad, N_pad)
    bo_p = pad2(bo, 1, N_pad)

    grid = (B_pad // tile_m, D_pad // tile_d)

    in_specs = [
        pl.BlockSpec((tile_m, K), lambda i, k: (i, 0)),       # x
        pl.BlockSpec((tile_m, K), lambda i, k: (i, 0)),       # y
        pl.BlockSpec((K, tile_d), lambda i, k: (0, k)),       # wx
        pl.BlockSpec((1, tile_d), lambda i, k: (0, k)),       # bx
        pl.BlockSpec((K, tile_d), lambda i, k: (0, k)),       # wy
        pl.BlockSpec((1, tile_d), lambda i, k: (0, k)),       # by
        pl.BlockSpec((tile_d, N_pad), lambda i, k: (k, 0)),   # wo
        pl.BlockSpec((1, N_pad), lambda i, k: (0, 0)),        # bo
    ]
    out_specs = pl.BlockSpec((tile_m, N_pad), lambda i, k: (i, 0))

    # ---- VMEM budget (double-buffered inputs/outputs + f32 accumulator).
    itemsize = 4
    per_step_elems = (2 * tile_m * K            # x, y tiles
                      + 2 * K * tile_d          # wx, wy tiles
                      + 2 * tile_d              # bx, by
                      + tile_d * N_pad          # wo tile
                      + N_pad)                  # bo
    vmem_est = (2 * per_step_elems + 3 * tile_m * N_pad) * itemsize
    vmem_limit = int(min(max(2 * vmem_est, 16 << 20), 60 << 20))  # safe on v7x's 64 MiB

    cost = pl.CostEstimate(
        flops=2 * B * (2 * K * D + D * N),
        transcendentals=B * D,
        bytes_accessed=(x_p.size + y_p.size + wx_p.size + bx_p.size + wy_p.size
                        + by_p.size + wo_p.size + bo_p.size
                        + B_pad * N_pad) * itemsize,
    )

    kernel = functools.partial(gated_fusion_kernel, x_gate=bool(x_gate))

    out_p = pl.pallas_call(
        kernel,
        out_shape=jax.ShapeDtypeStruct((B_pad, N_pad), jnp.float32),
        grid=grid,
        in_specs=in_specs,
        out_specs=out_specs,
        scratch_shapes=[pltpu.VMEM((tile_m, N_pad), jnp.float32)],
        compiler_params=pltpu.CompilerParams(
            dimension_semantics=("parallel", "arbitrary"),
            vmem_limit_bytes=vmem_limit,
        ),
        cost_estimate=cost,
    )(x_p, y_p, wx_p, bx_p, wy_p, by_p, wo_p, bo_p)

    return out_p[:B, :N]


def init_params(key, input_dim, dim, output_dim):
    # Deterministic synthetic init (uniform, roughly matching nn.Linear scale).
    ks = jax.random.split(key, 6)

    def lin(kw, kb, fan_in, fan_out):
        bound = 1.0 / jnp.sqrt(fan_in)
        w = jax.random.uniform(kw, (fan_in, fan_out), jnp.float32, -bound, bound)
        b = jax.random.uniform(kb, (1, fan_out), jnp.float32, -bound, bound)
        return w, b

    wx, bx = lin(ks[0], ks[1], input_dim, dim)
    wy, by = lin(ks[2], ks[3], input_dim, dim)
    wo, bo = lin(ks[4], ks[5], dim, output_dim)
    return wx, bx, wy, by, wo, bo


def gated_fusion_ref(x, y, params, x_gate=True):
    wx, bx, wy, by, wo, bo = params
    out_x = x @ wx + bx
    out_y = y @ wy + by
    if x_gate:
        fused = jax.nn.sigmoid(out_x) * out_y
    else:
        fused = out_x * jax.nn.sigmoid(out_y)
    return fused @ wo + bo


if __name__ == "__main__":
    key = jax.random.PRNGKey(0)
    kx, ky, kp = jax.random.split(key, 3)

    batch, input_dim, dim, output_dim = 8, 32, 32, 16
    x = jax.random.normal(kx, (batch, input_dim), jnp.float32)
    y = jax.random.normal(ky, (batch, input_dim), jnp.float32)
    params = init_params(kp, input_dim, dim, output_dim)

    for gate_flag in (True, False):
        out = gated_fusion(x, y, params, x_gate=gate_flag)
        out = jax.block_until_ready(out)
        ref = gated_fusion_ref(x, y, params, x_gate=gate_flag)
        assert out.shape == (batch, output_dim)
        assert jnp.allclose(out, ref, atol=1e-5, rtol=1e-5), (
            f"mismatch for x_gate={gate_flag}: "
            f"{jnp.max(jnp.abs(out - ref))}")

    print("KERNEL_OK")
</pallas_src>

<mosaic_0001>
module attributes {stable_mosaic.version = 11 : i64} {
  func.func @gated_fusion_kernel(%arg0: i32, %arg1: i32, %arg2: memref<8x32xf32, #tpu.memory_space<vmem>>, %arg3: memref<8x32xf32, #tpu.memory_space<vmem>>, %arg4: memref<32x128xf32, #tpu.memory_space<vmem>>, %arg5: memref<1x128xf32, #tpu.memory_space<vmem>>, %arg6: memref<32x128xf32, #tpu.memory_space<vmem>>, %arg7: memref<1x128xf32, #tpu.memory_space<vmem>>, %arg8: memref<128x128xf32, #tpu.memory_space<vmem>>, %arg9: memref<1x128xf32, #tpu.memory_space<vmem>>, %arg10: memref<8x128xf32, #tpu.memory_space<vmem>>, %arg11: memref<8x128xf32, #tpu.memory_space<vmem>>) attributes {dimension_semantics = [#tpu.dimension_semantics<parallel>, #tpu.dimension_semantics<arbitrary>], iteration_bounds = array<i64: 1, 1>, scalar_prefetch = 0 : i64, scratch_operands = 1 : i64, tpu.core_type = #tpu.core_type<tc>, window_params = [{transform_indices = @transform_0, window_bounds = array<i64: 8, 32>}, {transform_indices = @transform_1, window_bounds = array<i64: 8, 32>}, {transform_indices = @transform_2, window_bounds = array<i64: 32, 128>}, {transform_indices = @transform_3, window_bounds = array<i64: 1, 128>}, {transform_indices = @transform_4, window_bounds = array<i64: 32, 128>}, {transform_indices = @transform_5, window_bounds = array<i64: 1, 128>}, {transform_indices = @transform_6, window_bounds = array<i64: 128, 128>}, {pipeline_mode = #tpu.pipeline_mode<synchronous>, transform_indices = @transform_7, window_bounds = array<i64: 1, 128>}, {transform_indices = @transform_8, window_bounds = array<i64: 8, 128>}]} {
    %c0_i32 = arith.constant 0 : i32
    %0 = arith.cmpi eq, %arg1, %c0_i32 : i32
    %1 = arith.extui %0 : i1 to i32
    %c0_i32_0 = arith.constant 0 : i32
    %2 = arith.cmpi ne, %1, %c0_i32_0 : i32
    scf.if %2 {
      %cst_24 = arith.constant 0.000000e+00 : f32
      %30 = vector.broadcast %cst_24 : f32 to vector<8x128xf32>
      %c0_25 = arith.constant 0 : index
      %c0_26 = arith.constant 0 : index
      %31 = vector.load %arg11[%c0_25, %c0_26] : memref<8x128xf32, #tpu.memory_space<vmem>>, vector<8x128xf32>
      tpu.vector_store %arg11[%c0_25, %c0_26], %30 {strides = array<i32>} : memref<8x128xf32, #tpu.memory_space<vmem>>, vector<8x128xf32>,
    } else {
    }
    %c0 = arith.constant 0 : index
    %c0_1 = arith.constant 0 : index
    %3 = vector.load %arg2[%c0, %c0_1] : memref<8x32xf32, #tpu.memory_space<vmem>>, vector<8x32xf32>
    %c0_2 = arith.constant 0 : index
    %c0_3 = arith.constant 0 : index
    %4 = vector.load %arg3[%c0_2, %c0_3] : memref<8x32xf32, #tpu.memory_space<vmem>>, vector<8x32xf32>
    %c0_4 = arith.constant 0 : index
    %c0_5 = arith.constant 0 : index
    %5 = vector.load %arg4[%c0_4, %c0_5] : memref<32x128xf32, #tpu.memory_space<vmem>>, vector<32x128xf32>
    %cst = arith.constant dense<0.000000e+00> : vector<8x128xf32>
    %6 = tpu.matmul %3, %5, %cst {dimension_numbers = #tpu.dot_dimension_numbers<[1], [0], [0], [1], [0, 0, 1, 1], [], []>} : vector<8x32xf32>, vector<32x128xf32>, vector<8x128xf32> -> vector<8x128xf32>
    %c0_6 = arith.constant 0 : index
    %c0_7 = arith.constant 0 : index
    %7 = vector.load %arg5[%c0_6, %c0_7] : memref<1x128xf32, #tpu.memory_space<vmem>>, vector<1x128xf32>
    %8 = vector.broadcast %7 : vector<1x128xf32> to vector<8x128xf32>
    %9 = arith.addf %6, %8 : vector<8x128xf32>
    %c0_8 = arith.constant 0 : index
    %c0_9 = arith.constant 0 : index
    %10 = vector.load %arg6[%c0_8, %c0_9] : memref<32x128xf32, #tpu.memory_space<vmem>>, vector<32x128xf32>
    %cst_10 = arith.constant dense<0.000000e+00> : vector<8x128xf32>
    %11 = tpu.matmul %4, %10, %cst_10 {dimension_numbers = #tpu.dot_dimension_numbers<[1], [0], [0], [1], [0, 0, 1, 1], [], []>} : vector<8x32xf32>, vector<32x128xf32>, vector<8x128xf32> -> vector<8x128xf32>
    %c0_11 = arith.constant 0 : index
    %c0_12 = arith.constant 0 : index
    %12 = vector.load %arg7[%c0_11, %c0_12] : memref<1x128xf32, #tpu.memory_space<vmem>>, vector<1x128xf32>
    %13 = vector.broadcast %12 : vector<1x128xf32> to vector<8x128xf32>
    %14 = arith.addf %11, %13 : vector<8x128xf32>
    %cst_13 = arith.constant 0.000000e+00 : f32
    %15 = vector.broadcast %cst_13 : f32 to vector<8x128xf32>
    %16 = arith.subf %15, %9 : vector<8x128xf32>
    %17 = math.exp %16 : vector<8x128xf32>
    %cst_14 = arith.constant 1.000000e+00 : f32
    %18 = vector.broadcast %cst_14 : f32 to vector<8x128xf32>
    %19 = arith.addf %18, %17 : vector<8x128xf32>
    %20 = tpu.reciprocal %19 : vector<8x128xf32> -> vector<8x128xf32>
    %21 = arith.mulf %20, %14 : vector<8x128xf32>
    %c0_15 = arith.constant 0 : index
    %c0_16 = arith.constant 0 : index
    %22 = vector.load %arg11[%c0_15, %c0_16] : memref<8x128xf32, #tpu.memory_space<vmem>>, vector<8x128xf32>
    %c0_17 = arith.constant 0 : index
    %c0_18 = arith.constant 0 : index
    %23 = vector.load %arg8[%c0_17, %c0_18] : memref<128x128xf32, #tpu.memory_space<vmem>>, vector<128x128xf32>
    %cst_19 = arith.constant dense<0.000000e+00> : vector<8x128xf32>
    %24 = tpu.matmul %21, %23, %cst_19 {dimension_numbers = #tpu.dot_dimension_numbers<[1], [0], [0], [1], [0, 0, 1, 1], [], []>} : vector<8x128xf32>, vector<128x128xf32>, vector<8x128xf32> -> vector<8x128xf32>
    %25 = arith.addf %22, %24 : vector<8x128xf32>
    %c0_20 = arith.constant 0 : index
    %c0_21 = arith.constant 0 : index
    %26 = vector.load %arg11[%c0_20, %c0_21] : memref<8x128xf32, #tpu.memory_space<vmem>>, vector<8x128xf32>
    tpu.vector_store %arg11[%c0_20, %c0_21], %25 {strides = array<i32>} : memref<8x128xf32, #tpu.memory_space<vmem>>, vector<8x128xf32>,
    %c0_i32_22 = arith.constant 0 : i32
    %27 = arith.cmpi eq, %arg1, %c0_i32_22 : i32
    %28 = arith.extui %27 : i1 to i32
    %c0_i32_23 = arith.constant 0 : i32
    %29 = arith.cmpi ne, %28, %c0_i32_23 : i32
    scf.if %29 {
      %c0_24 = arith.constant 0 : index
      %c0_25 = arith.constant 0 : index
      %30 = vector.load %arg11[%c0_24, %c0_25] : memref<8x128xf32, #tpu.memory_space<vmem>>, vector<8x128xf32>
      %c0_26 = arith.constant 0 : index
      %c0_27 = arith.constant 0 : index
      %31 = vector.load %arg9[%c0_26, %c0_27] : memref<1x128xf32, #tpu.memory_space<vmem>>, vector<1x128xf32>
      %32 = vector.broadcast %31 : vector<1x128xf32> to vector<8x128xf32>
      %33 = arith.addf %30, %32 : vector<8x128xf32>
      %c0_28 = arith.constant 0 : index
      %c0_29 = arith.constant 0 : index
      %34 = vector.load %arg10[%c0_28, %c0_29] : memref<8x128xf32, #tpu.memory_space<vmem>>, vector<8x128xf32>
      tpu.vector_store %arg10[%c0_28, %c0_29], %33 {strides = array<i32>} : memref<8x128xf32, #tpu.memory_space<vmem>>, vector<8x128xf32>,
    } else {
    }
    return
  }
  func.func @transform_0(%arg0: i32, %arg1: i32) -> (i32, i32) {
    %c0_i32 = arith.constant 0 : i32
    %c0_i32_0 = arith.constant 0 : i32
    return %arg0, %c0_i32 : i32, i32
  }
  func.func @transform_1(%arg0: i32, %arg1: i32) -> (i32, i32) {
    %c0_i32 = arith.constant 0 : i32
    %c0_i32_0 = arith.constant 0 : i32
    return %arg0, %c0_i32 : i32, i32
  }
  func.func @transform_2(%arg0: i32, %arg1: i32) -> (i32, i32) {
    %c0_i32 = arith.constant 0 : i32
    %c0_i32_0 = arith.constant 0 : i32
    return %c0_i32, %arg1 : i32, i32
  }
  func.func @transform_3(%arg0: i32, %arg1: i32) -> (i32, i32) {
    %c0_i32 = arith.constant 0 : i32
    %c0_i32_0 = arith.constant 0 : i32
    return %c0_i32, %arg1 : i32, i32
  }
  func.func @transform_4(%arg0: i32, %arg1: i32) -> (i32, i32) {
    %c0_i32 = arith.constant 0 : i32
    %c0_i32_0 = arith.constant 0 : i32
    return %c0_i32, %arg1 : i32, i32
  }
  func.func @transform_5(%arg0: i32, %arg1: i32) -> (i32, i32) {
    %c0_i32 = arith.constant 0 : i32
    %c0_i32_0 = arith.constant 0 : i32
    return %c0_i32, %arg1 : i32, i32
  }
  func.func @transform_6(%arg0: i32, %arg1: i32) -> (i32, i32) {
    %c0_i32 = arith.constant 0 : i32
    %c0_i32_0 = arith.constant 0 : i32
    return %arg1, %c0_i32 : i32, i32
  }
  func.func @transform_7(%arg0: i32, %arg1: i32) -> (i32, i32) {
    %c0_i32 = arith.constant 0 : i32
    %c0_i32_0 = arith.constant 0 : i32
    %c0_i32_1 = arith.constant 0 : i32
    return %c0_i32, %c0_i32_0 : i32, i32
  }
  func.func @transform_8(%arg0: i32, %arg1: i32) -> (i32, i32) {
    %c0_i32 = arith.constant 0 : i32
    %c0_i32_0 = arith.constant 0 : i32
    return %arg0, %c0_i32 : i32, i32
  }
}

</mosaic_0001>

<bundles_post_ra>
// kernel: tpu_custom_call.1
= control target key start
LH: loop header
LB: loop body
LE: loop exit
PB: predicated region body
PF: predicated region fallthrough
CT: control target
= control target key end

     0   :  { %13 = vsyncpa [#allocation4], 0  ;;  %s749_s0 = inlined_call_operand.hbm [shape: f32[8,32], index: 0, kind: input, shape index: {}]   ;;  %s750_s1 = inlined_call_operand.hbm [shape: f32[8,32], index: 1, kind: input, shape index: {}]   ;;  %s751_s2 = inlined_call_operand.hbm [shape: f32[32,128], index: 2, kind: input, shape index: {}]   ;;  %s752_s3 = inlined_call_operand.vmem [shape: f32[1,128], index: 3, kind: input, shape index: {}]   ;;  %s753_s4 = inlined_call_operand.hbm [shape: f32[32,128], index: 4, kind: input, shape index: {}]   ;;  %s754_s5 = inlined_call_operand.vmem [shape: f32[1,128], index: 5, kind: input, shape index: {}]   ;;  %s755_s6 = inlined_call_operand.hbm [shape: f32[128,128], index: 6, kind: input, shape index: {}]   ;;  %s756_s7 = inlined_call_operand.vmem [shape: f32[1,128], index: 7, kind: input, shape index: {}]   ;;  %s757_s8 = inlined_call_operand.hbm [shape: f32[8,128], index: 8, kind: output, shape index: {}]  }
   0x1   :  { %14 = vsyncpa [#allocation7], 0 }
   0x2   :  { %15 = vsyncpa [#allocation10], 0 }
   0x3   :  { %16 = vsyncpa [#allocation5], 0  ;;  %s626_s27 = smov [#allocation6]  }
   0x4   :  { %s33_s28 = sshll.u32 %s626_s27, 4  ;;  %s34_s28 = int_to_ptr.vmem [resolvable:$true] %s33_s28 }
   0x5   :  { %s506_s29 = scalar_lea.vmem %s34_s28, 128  ;;  %p511_p1 = scmp.lt.s32.totalorder %s34_s28, %s34_s28 }
   0x6   :  { %p507_p0 = scmp.ne.s32.totalorder %s34_s28, %s506_s29  ;;  %p512_p2 = scmp.lt.s32.totalorder %s506_s29, %s506_s29 }
   0x8   :  { %p513_p3 = por %p512_p2, %p511_p1 }
   0xa   :  { %p514_p4 = pnand %p513_p3, %p507_p0 }
   0xc   :  { %517 = shalt.err (!%p514_p4)
}
   0xd   :  { %36 = dma.hbm_to_vmem [thread:$0]  %s750_s1, 128, %s34_s28, [#allocation7]  }
   0xe   :  { %s627_s10 = smov [#allocation9]   ;;  %s628_s12 = smov [#allocation3]  }
   0xf   :  { %s56_s11 = sshll.u32 %s627_s10, 4  ;;  %s23_s13 = sshll.u32 %s628_s12, 4  ;;  %s57_s11 = int_to_ptr.vmem [resolvable:$true] %s56_s11  ;;  %s24_s13 = int_to_ptr.vmem [resolvable:$true] %s23_s13 }
  0x10   :  { %s526_s14 = scalar_lea.vmem %s57_s11, 512  ;;  %p531_p6 = scmp.lt.s32.totalorder %s57_s11, %s57_s11 }
  0x11   :  { %p527_p5 = scmp.ne.s32.totalorder %s57_s11, %s526_s14  ;;  %p532_p7 = scmp.lt.s32.totalorder %s526_s14, %s526_s14 }
  0x13   :  { %p533_p8 = por %p532_p7, %p531_p6 }
  0x15   :  { %p534_p9 = pnand %p533_p8, %p527_p5 }
  0x17   :  { %537 = shalt.err (!%p534_p9)
}
  0x18   :  { %s629_s15 = smov 128   ;;  %s630_s16 = smov 8  }
  0x19   :  { %62 = dma.hbm_to_vmem [thread:$0]  %s753_s4, 512, %s57_s11, [#allocation10], %s629_s15, %s629_s15, %s630_s16  }
  0x1a   :  { %s546_s1 = scalar_lea.vmem %s24_s13, 128  ;;  %p551_p11 = scmp.lt.s32.totalorder %s24_s13, %s24_s13 }
  0x1b   :  { %p547_p10 = scmp.ne.s32.totalorder %s24_s13, %s546_s1  ;;  %p552_p12 = scmp.lt.s32.totalorder %s546_s1, %s546_s1 }
  0x1d   :  { %p553_p13 = por %p552_p12, %p551_p11 }
  0x1f   :  { %p554_p0 = pnand %p553_p13, %p547_p10 }
  0x21   :  { %557 = shalt.err (!%p554_p0)
}
  0x22   :  { %26 = dma.hbm_to_vmem [thread:$0]  %s749_s0, 128, %s24_s13, [#allocation4]  }
  0x23   :  { %s631_s21 = smov [#allocation8]   ;;  %s632_s23 = smov [#allocation11]  }
  0x24   :  { %s42_s22 = sshll.u32 %s631_s21, 4  ;;  %s70_s24 = sshll.u32 %s632_s23, 4  ;;  %s43_s22 = int_to_ptr.vmem [resolvable:$true] %s42_s22  ;;  %s71_s24 = int_to_ptr.vmem [resolvable:$true] %s70_s24 }
  0x25   :  { %s566_s25 = scalar_lea.vmem %s43_s22, 512  ;;  %p571_p2 = scmp.lt.s32.totalorder %s43_s22, %s43_s22 }
  0x26   :  { %p567_p1 = scmp.ne.s32.totalorder %s43_s22, %s566_s25  ;;  %p572_p3 = scmp.lt.s32.totalorder %s566_s25, %s566_s25 }
  0x28   :  { %p573_p4 = por %p572_p3, %p571_p2 }
  0x2a   :  { %p574_p5 = pnand %p573_p4, %p567_p1 }
  0x2c   :  { %577 = shalt.err (!%p574_p5)
}
  0x2d   :  { %48 = dma.hbm_to_vmem [thread:$0]  %s751_s2, 512, %s43_s22, [#allocation7], %s629_s15, %s629_s15, %s630_s16  }
  0x2e   :  { %s586_s0 = scalar_lea.vmem %s71_s24, 2048  ;;  %p591_p7 = scmp.lt.s32.totalorder %s71_s24, %s71_s24 }
  0x2f   :  { %p587_p6 = scmp.ne.s32.totalorder %s71_s24, %s586_s0  ;;  %p592_p8 = scmp.lt.s32.totalorder %s586_s0, %s586_s0 }
  0x31   :  { %p593_p9 = por %p592_p8, %p591_p7 }
  0x33   :  { %p594_p10 = pnand %p593_p9, %p587_p6 }
  0x35   :  { %597 = shalt.err (!%p594_p10)
}
  0x36   :  { %76 = dma.hbm_to_vmem [thread:$0]  %s755_s6, 2048, %s71_s24, [#allocation10], %s629_s15, %s629_s15, %s630_s16  }
  0x37   :  { %618 = dma.done.wait [#allocation4], 128  }
  0x38   :  { %619 = vsyncadd [#allocation4], 4294967168 }
  0x39   :  { %620 = dma.done.wait [#allocation7], 640  }
  0x3a   :  { %621 = vsyncadd [#allocation7], 4294966656 }
  0x3b   :  { %622 = dma.done.wait [#allocation10], 2560  }
  0x3c   :  { %623 = vsyncadd [#allocation10], 4294964736  ;;  %v633_v0 = vmov 0.0   ;;  %vm634_vm0 = vmmov 0   ;;  %v104_v1 = vld [vmem:[#allocation8 + $0x18] sm:$0xff]  ;;  %v103_v2 = vld [vmem:[#allocation8 + $0x10] sm:$0xff] }
  0x3d   :  { %427 = vmatprep.subr.mxu1 %v633_v0  ;;  %435 = vmatprep.mubr.msk.f32.mxu1 %vm634_vm0, %v633_v0  ;;  %v102_v3 = vld [vmem:[#allocation8 + $0x8] sm:$0xff]  ;;  %v101_v4 = vld [vmem:[#allocation8] sm:$0xff]  ;;  %v99_v5 = vld [vmem:[#allocation3] sm:$0xff]  ;;  %vm112_vm1 = vcmask 261120   ;;  %s635_s10 = smov [#allocation12]  }
  0x3e   :  { %449 = vmatprep.subr.mxu0 %v633_v0  ;;  %481 = vmatprep.mubr.msk.f32.mxu0 %vm634_vm0, %v633_v0  ;;  %v189_v6 = vld [vmem:[#allocation9 + $0x18] sm:$0xff]  ;;  %v188_v7 = vld [vmem:[#allocation9 + $0x10] sm:$0xff]  ;;  %v187_v8 = vld [vmem:[#allocation9 + $0x8] sm:$0xff]  ;;  %s384_s11 = sshll.u32 %s635_s10, 4  ;;  %s385_s11 = int_to_ptr.vmem [resolvable:$true] %s384_s11 }
  0x3f   :  { %428 = vmatpush3.msra.mxu1 %v104_v1  ;;  %v186_v9 = vld [vmem:[#allocation9] sm:$0xff]  ;;  %v100_v10 = vld [vmem:[#allocation6] sm:$0xff]  ;;  %v291_v12 = vld [vmem:[#allocation11 + $0x70] sm:$0xff]  ;;  %s598_s12 = scalar_lea.vmem %s385_s11, 128  ;;  %p603_p12 = scmp.lt.s32.totalorder %s385_s11, %s385_s11 }
  0x40   :  { %429 = vmatprep.subr.mxu1 %v633_v0  ;;  %v292_v11 = vld [vmem:[#allocation11 + $0x78] sm:$0xff]  ;;  %v290_v13 = vld [vmem:[#allocation11 + $0x68] sm:$0xff]  ;;  %v289_v14 = vld [vmem:[#allocation11 + $0x60] sm:$0xff]  ;;  %p599_p11 = scmp.ne.s32.totalorder %s385_s11, %s598_s12  ;;  %p604_p13 = scmp.lt.s32.totalorder %s598_s12, %s598_s12 }
  0x41   :  { %430 = vmatpush3.msra.mxu1 %v103_v2  ;;  %450 = vmatpush3.msra.mxu0 %v292_v11  ;;  %v288_v15 = vld [vmem:[#allocation11 + $0x58] sm:$0xff]  ;;  %v287_v16 = vld [vmem:[#allocation11 + $0x50] sm:$0xff]  ;;  %v286_v17 = vld [vmem:[#allocation11 + $0x48] sm:$0xff] }
  0x42   :  { %431 = vmatprep.subr.mxu1 %v633_v0  ;;  %451 = vmatprep.subr.mxu0 %v633_v0  ;;  %v285_v18 = vld [vmem:[#allocation11 + $0x40] sm:$0xff]  ;;  %v284_v19 = vld [vmem:[#allocation11 + $0x38] sm:$0xff]  ;;  %v283_v20 = vld [vmem:[#allocation11 + $0x30] sm:$0xff]  ;;  %p605_p0 = por %p604_p13, %p603_p12 }
  0x43   :  { %432 = vmatpush3.msra.mxu1 %v102_v3  ;;  %452 = vmatpush3.msra.mxu0 %v291_v12  ;;  %v282_v21 = vld [vmem:[#allocation11 + $0x28] sm:$0xff]  ;;  %v281_v22 = vld [vmem:[#allocation11 + $0x20] sm:$0xff]  ;;  %v280_v23 = vld [vmem:[#allocation11 + $0x18] sm:$0xff] }
  0x44   :  { %433 = vmatprep.subr.mxu1 %v633_v0  ;;  %453 = vmatprep.subr.mxu0 %v633_v0  ;;  %v279_v24 = vld [vmem:[#allocation11 + $0x10] sm:$0xff]  ;;  %v278_v25 = vld [vmem:[#allocation11 + $0x8] sm:$0xff]  ;;  %v277_v26 = vld [vmem:[#allocation11] sm:$0xff]  ;;  %p606_p1 = pnand %p605_p0, %p599_p11 }
  0x45   :  { %434 = vmatpush3.msra.mxu1 %v101_v4  ;;  %454 = vmatpush3.msra.mxu0 %v290_v13  ;;  %v395_v27 = vld [vmem:[%s752_s3] ss:$0 sm:$0xff] }
  0x46   :  { %436 = vmatmul.mubr.msk.f32.vlgmr.msra.gmra.mxu1 %vm112_vm1, %v99_v5  ;;  %438 = vmatprep.subr.mxu1 %v633_v0  ;;  %v397_v37 = vld [vmem:[%s754_s5] ss:$0 sm:$0xff] }
  0x47   :  { %439 = vmatpush3.msra.mxu1 %v189_v6  ;;  %446 = vmatprep.mubr.msk.f32.mxu1 %vm634_vm0, %v633_v0  ;;  %v399_v41 = vld [vmem:[%s756_s7] ss:$0 sm:$0xff] }
  0x48   :  { %440 = vmatprep.subr.mxu1 %v633_v0  ;;  %455 = vmatprep.subr.mxu0 %v633_v0 }
  0x49   :  { %441 = vmatpush3.msra.mxu1 %v188_v7  ;;  %456 = vmatpush3.msra.mxu0 %v289_v14 }
  0x4a   :  { %442 = vmatprep.subr.mxu1 %v633_v0  ;;  %457 = vmatprep.subr.mxu0 %v633_v0 }
  0x4b   :  { %443 = vmatpush3.msra.mxu1 %v187_v8  ;;  %458 = vmatpush3.msra.mxu0 %v288_v15 }
  0x4c   :  { %444 = vmatprep.subr.mxu1 %v633_v0  ;;  %459 = vmatprep.subr.mxu0 %v633_v0 }
  0x4d   :  { %445 = vmatpush3.msra.mxu1 %v186_v9  ;;  %460 = vmatpush3.msra.mxu0 %v287_v16 }
  0x4e   :  { %447 = vmatmul.mubr.msk.f32.vlgmr.msra.gmra.mxu1 %vm112_vm1, %v100_v10  ;;  %461 = vmatprep.subr.mxu0 %v633_v0 }
  0x4f   :  { %462 = vmatpush3.msra.mxu0 %v286_v17 }
  0x50   :  { %463 = vmatprep.subr.mxu0 %v633_v0 }
  0x51   :  { %464 = vmatpush3.msra.mxu0 %v285_v18 }
  0x52   :  { %465 = vmatprep.subr.mxu0 %v633_v0 }
  0x53   :  { %466 = vmatpush3.msra.mxu0 %v284_v19 }
  0x54   :  { %467 = vmatprep.subr.mxu0 %v633_v0 }
  0x55   :  { %468 = vmatpush3.msra.mxu0 %v283_v20 }
  0x56   :  { %469 = vmatprep.subr.mxu0 %v633_v0 }
  0x57   :  { %470 = vmatpush3.msra.mxu0 %v282_v21 }
  0x58   :  { %471 = vmatprep.subr.mxu0 %v633_v0 }
  0x59   :  { %472 = vmatpush3.msra.mxu0 %v281_v22 }
  0x5a   :  { %473 = vmatprep.subr.mxu0 %v633_v0 }
  0x5b   :  { %474 = vmatpush3.msra.mxu0 %v280_v23 }
  0x5c   :  { %475 = vmatprep.subr.mxu0 %v633_v0 }
  0x5d   :  { %476 = vmatpush3.msra.mxu0 %v279_v24 }
  0x5e   :  { %477 = vmatprep.subr.mxu0 %v633_v0 }
  0x5f   :  { %478 = vmatpush3.msra.mxu0 %v278_v25 }
  0x60   :  { %479 = vmatprep.subr.mxu0 %v633_v0 }
  0x61   :  { %480 = vmatpush3.msra.mxu0 %v277_v26 }
 0x106   :  { %v182_v28 = vpop.f32.mrf.mxu1 }
 0x107   :  { %v183_v29 = vadd.f32 %v395_v27, %v182_v28 }
 0x108   :  { %v437_v30 = vpop.f32.mrf.mxu1 }
 0x109   :  { %v270_v31 = vsub.f32 0.0, %v183_v29 }
 0x10b   :  { %v271_v32 = vmul.f32 1.442695, %v270_v31 }
 0x10d   :  { %494 = vpow2.f32 %v271_v32 }
 0x10e   :  { %v266_v33 = vpop.f32.mrf.mxu1 }
 0x10f   :  { %v267_v38 = vadd.f32 %v397_v37, %v266_v33 }
 0x110   :  { %v448_v34 = vpop.f32.mrf.mxu1 }
 0x11a   :  { %v495_v35 = vpop.eup %494 }
 0x11b   :  { %v273_v36 = vadd.f32 1.0, %v495_v35 }
 0x11d   :  { %496 = vrcp.f32 %v273_v36 }
 0x12a   :  { %v497_v39 = vpop.eup %496 }
 0x12b   :  { %v275_v40 = vmul.f32 %v497_v39, %v267_v38 }
 0x12d   :  { %482 = vmatmul.mubr.f32.vlgmr.msra.gmra.mxu0 %v275_v40 }
 0x1ed   :  { %v359_v42 = vpop.f32.mrf.mxu0 }
 0x1ee   :  { %v376_v43 = vadd.f32 %v399_v41, %v359_v42 }
 0x1ef   :  { %v483_v44 = vpop.f32.mrf.mxu0 }
 0x1f0   :  { %377 = vst [vmem:[#allocation12] sm:$0xff] %v376_v43 }
 0x1f1   :  { %609 = shalt.err (!%p606_p1)
}
 0x1f2   :  { %387 = dma.vmem_to_hbm [thread:$0]  %s385_s11, 128, %s757_s8, [#allocation5]  }
 0x1f3   :  { %624 = dma.done.wait [#allocation5], 128  }
 0x1f4   :  { %625 = vsyncadd [#allocation5], 4294967168 }
 0x1f5   :  { %391 = vsyncpa [#allocation4], 1 }
 0x1f6   :  { %392 = vsyncpa [#allocation7], 1 }
 0x1f7   :  { %393 = vsyncpa [#allocation10], 1 }
 0x1f8   :  { %394 = vsyncpa [#allocation5], 1 }

</bundles_post_ra>
